<compile_context>
chip_gen: v6e
topology: v6e:2x2x1
jax: 0.10.0
libtpu: 0.0.40
codegen_flags: <defaults>
</compile_context>

<pallas_src>
import numpy as np
import jax
import jax.numpy as jnp
from jax.experimental import pallas as pl
from jax.experimental.pallas import tpu as pltpu

SIZES = (1, 2, 3, 6)                                   # pyramid pooling sizes (module default)
S = len(SIZES)
ROW_BLKS = tuple(-(-(s * s) // 8) * 8 for s in SIZES)  # per-stage row blocks, 8-aligned: 8,8,16,40
_cum = np.cumsum((0,) + ROW_BLKS)
ROW_OFFS = tuple(int(v) for v in _cum[:-1])            # (0, 8, 16, 32)
PPAD = int(_cum[-1])                                   # 72 stacked pooled rows (zero padded)
TILE_HW = 256                                          # pixel rows per grid step (MXU friendly)
VMEM_LIMIT = 48 * 1024 * 1024                          # headroom under v7x's 64 MiB physical VMEM


def _round_up(x, m):
    return -(-x // m) * m


# ----------------------------------------------------------------------------
# Static 1-D operators (numpy, built once in the wrapper).
# ----------------------------------------------------------------------------
def adaptive_pool_1d(out_size, in_size):
    """Row-stochastic P (out_size, in_size): P @ x == AdaptiveAvgPool1d(x)."""
    P = np.zeros((out_size, in_size), np.float32)
    for i in range(out_size):
        start = (i * in_size) // out_size
        end = -(-((i + 1) * in_size) // out_size)
        P[i, start:end] = 1.0 / (end - start)
    return P


def bilinear_up_1d(out_size, in_size):
    """U (out_size, in_size): bilinear interpolation, align_corners=False."""
    U = np.zeros((out_size, in_size), np.float32)
    scale = in_size / out_size
    for i in range(out_size):
        real = max((i + 0.5) * scale - 0.5, 0.0)
        x0 = min(int(np.floor(real)), in_size - 1)
        lam = real - x0
        x1 = min(x0 + 1, in_size - 1)
        U[i, x0] += 1.0 - lam
        U[i, x1] += lam
    return U


# ----------------------------------------------------------------------------
# Pass 1: stacked adaptive avg-pool (reduction over HW tiles) + fused per-stage
#         weights.  Output T[b] has, for stage k, rows ROW_OFFS[k]:+blk equal to
#         (pooled_k @ Ws_k^T @ Wb_k^T) in the (already padded) Cout space.
#   pstk_ref  : (PPAD, THW)       stacked pooling matrix tile (bf16)
#   x_ref     : (1, THW, Cp)      input pixel tile (bf16)
#   m_ref     : (S, Cp, CoutP)    fused stage weights (bf16)
#   t_ref     : (1, PPAD, CoutP)  output branch activations (bf16)
#   pooled_acc: (PPAD, Cp) f32 scratch accumulator
# ----------------------------------------------------------------------------
def _pool_stage_kernel(pstk_ref, x_ref, m_ref, t_ref, pooled_acc):
    t = pl.program_id(1)

    @pl.when(t == 0)
    def _():
        pooled_acc[...] = jnp.zeros_like(pooled_acc)

    pooled_acc[...] += jnp.dot(pstk_ref[...], x_ref[0],
                               preferred_element_type=jnp.float32)

    @pl.when(t == pl.num_programs(1) - 1)
    def _():
        pooled = pooled_acc[...].astype(jnp.bfloat16)
        for i in range(S):                       # static unroll; padded rows are zero
            off, blk = ROW_OFFS[i], ROW_BLKS[i]
            part = jnp.dot(pooled[off:off + blk], m_ref[i],
                           preferred_element_type=jnp.float32)
            t_ref[0, off:off + blk, :] = part.astype(t_ref.dtype)


# ----------------------------------------------------------------------------
# Pass 2: identity branch + stacked bilinear upsample of all pyramid branches
#         + bias + ReLU, tiled over (batch, HW).  Two full-width matmuls per tile.
#   x_ref  : (1, THW, Cp)        input pixel tile (bf16)
#   u_ref  : (THW, PPAD)         stacked upsample matrix tile (bf16)
#   t_ref  : (1, PPAD, CoutP)    branch activations from pass 1 (bf16)
#   wid_ref: (Cp, CoutP)         bottleneck slice for the identity branch (bf16)
#   b_ref  : (1, CoutP)          bottleneck bias (f32)
#   o_ref  : (1, THW, CoutP)     output pixel tile (f32)
# ----------------------------------------------------------------------------
def _upsample_bottleneck_kernel(x_ref, u_ref, t_ref, wid_ref, b_ref, o_ref):
    acc = jnp.dot(x_ref[0], wid_ref[...], preferred_element_type=jnp.float32)
    acc = acc + jnp.dot(u_ref[...], t_ref[0], preferred_element_type=jnp.float32)
    o_ref[0] = jnp.maximum(acc + b_ref[...], 0.0).astype(o_ref.dtype)


# ----------------------------------------------------------------------------
# Wrapper
# ----------------------------------------------------------------------------
def psp_forward(feats_nchw, stage_w, bot_w, bot_b):
    """feats_nchw: (N, C, H, W). stage_w: (S, C, C). bot_w: (Cout, (S+1)*C). bot_b: (Cout,)."""
    N, C, H, W = feats_nchw.shape
    HW = H * W
    Cout = bot_w.shape[0]
    Cp = _round_up(C, 128)
    CoutP = _round_up(Cout, 128)

    if HW >= TILE_HW:
        thw = TILE_HW
        HWp = _round_up(HW, thw)
    else:
        HWp = _round_up(HW, 8)
        thw = HWp
    n_hw = HWp // thw

    # NCHW -> (N, HWp, Cp), zero padded (exact: the matching weight rows are zero), bf16.
    x = jnp.transpose(feats_nchw, (0, 2, 3, 1)).reshape(N, HW, C).astype(jnp.float32)
    x = jnp.pad(x, ((0, 0), (0, HWp - HW), (0, Cp - C))).astype(jnp.bfloat16)

    # Stacked pooling / upsample operators (static, built once).
    pool_np = np.zeros((PPAD, HWp), np.float32)
    up_np = np.zeros((HWp, PPAD), np.float32)
    for k, s in enumerate(SIZES):
        Ph, Pw = adaptive_pool_1d(s, H), adaptive_pool_1d(s, W)
        Uh, Uw = bilinear_up_1d(H, s), bilinear_up_1d(W, s)
        off = ROW_OFFS[k]
        pool_np[off:off + s * s, :HW] = np.kron(Ph, Pw)
        up_np[:HW, off:off + s * s] = np.kron(Uh, Uw)
    pool_m = jnp.asarray(pool_np).astype(jnp.bfloat16)
    up_m = jnp.asarray(up_np).astype(jnp.bfloat16)

    # Fold each stage's 1x1 conv into its bottleneck slice: M_k = Ws_k^T @ Wb_k^T (C, Cout).
    stage_w = stage_w.astype(jnp.float32)
    bot_w = bot_w.astype(jnp.float32)
    m_fused = jnp.stack(
        [stage_w[k].T @ bot_w[:, k * C:(k + 1) * C].T for k in range(S)], axis=0)
    m_fused = jnp.zeros((S, Cp, CoutP), jnp.float32).at[:, :C, :Cout].set(m_fused)
    m_fused = m_fused.astype(jnp.bfloat16)

    w_id = jnp.zeros((Cp, CoutP), jnp.float32).at[:C, :Cout].set(bot_w[:, S * C:].T)
    w_id = w_id.astype(jnp.bfloat16)
    bias = jnp.zeros((1, CoutP), jnp.float32).at[0, :Cout].set(bot_b.astype(jnp.float32))

    # --- pass 1: pooling (HW reduction) + fused per-stage weights ---------------------
    t_branches = pl.pallas_call(
        _pool_stage_kernel,
        out_shape=jax.ShapeDtypeStruct((N, PPAD, CoutP), jnp.bfloat16),
        grid_spec=pltpu.PrefetchScalarGridSpec(
            num_scalar_prefetch=0,
            grid=(N, n_hw),
            in_specs=[
                pl.BlockSpec((PPAD, thw), lambda n, t: (0, t)),
                pl.BlockSpec((1, thw, Cp), lambda n, t: (n, t, 0)),
                pl.BlockSpec((S, Cp, CoutP), lambda n, t: (0, 0, 0)),
            ],
            out_specs=pl.BlockSpec((1, PPAD, CoutP), lambda n, t: (n, 0, 0)),
            scratch_shapes=[pltpu.VMEM((PPAD, Cp), jnp.float32)],
        ),
        compiler_params=pltpu.CompilerParams(
            dimension_semantics=("parallel", "arbitrary"),
            vmem_limit_bytes=VMEM_LIMIT),
    )(pool_m, x, m_fused)

    # --- pass 2: identity branch + stacked upsample + bias + ReLU ---------------------
    out = pl.pallas_call(
        _upsample_bottleneck_kernel,
        out_shape=jax.ShapeDtypeStruct((N, HWp, CoutP), jnp.float32),
        grid_spec=pltpu.PrefetchScalarGridSpec(
            num_scalar_prefetch=0,
            grid=(N, n_hw),
            in_specs=[
                pl.BlockSpec((1, thw, Cp), lambda n, t: (n, t, 0)),
                pl.BlockSpec((thw, PPAD), lambda n, t: (t, 0)),
                pl.BlockSpec((1, PPAD, CoutP), lambda n, t: (n, 0, 0)),
                pl.BlockSpec((Cp, CoutP), lambda n, t: (0, 0)),
                pl.BlockSpec((1, CoutP), lambda n, t: (0, 0)),
            ],
            out_specs=pl.BlockSpec((1, thw, CoutP), lambda n, t: (n, t, 0)),
        ),
        compiler_params=pltpu.CompilerParams(
            dimension_semantics=("parallel", "parallel"),
            vmem_limit_bytes=VMEM_LIMIT),
    )(x, up_m, t_branches, w_id, bias)

    # strip HW / channel padding, back to NCHW
    out = out[:, :HW, :Cout].reshape(N, H, W, Cout)
    return jnp.transpose(out, (0, 3, 1, 2))


# ----------------------------------------------------------------------------
# Pure numpy reference (same semantics as the PyTorch module) for sanity check.
# ----------------------------------------------------------------------------
def psp_reference(feats, stage_w, bot_w, bot_b):
    feats = np.asarray(feats, np.float32)
    N, C, H, W = feats.shape
    priors = []
    for k, s in enumerate(SIZES):
        Ph, Pw = adaptive_pool_1d(s, H), adaptive_pool_1d(s, W)
        pooled = np.einsum("ph,qw,nchw->ncpq", Ph, Pw, feats)
        conv = np.einsum("oc,ncpq->nopq", np.asarray(stage_w[k]), pooled)
        Uh, Uw = bilinear_up_1d(H, s), bilinear_up_1d(W, s)
        priors.append(np.einsum("hp,wq,ncpq->nchw", Uh, Uw, conv))
    priors.append(feats)
    cat = np.concatenate(priors, axis=1)
    out = np.einsum("oc,nchw->nohw", np.asarray(bot_w), cat) + np.asarray(bot_b)[None, :, None, None]
    return np.maximum(out, 0.0)


if __name__ == "__main__":
    # Small, module-consistent shapes: batch=2, features=4, spatial=16x16, out_features=32.
    N, C, H, W = 2, 4, 16, 16
    OUT_FEATURES = 32

    key = jax.random.PRNGKey(0)
    k_x, k_ws, k_wb, k_b = jax.random.split(key, 4)

    feats = jax.random.normal(k_x, (N, C, H, W), dtype=jnp.float32)
    # PyTorch conv shapes with kernel_size=1 squeezed:
    stage_w = 0.1 * jax.random.normal(k_ws, (S, C, C), dtype=jnp.float32)              # (Cout=C, Cin=C) per stage
    bot_w = 0.1 * jax.random.normal(k_wb, (OUT_FEATURES, (S + 1) * C), dtype=jnp.float32)
    bot_b = 0.1 * jax.random.normal(k_b, (OUT_FEATURES,), dtype=jnp.float32)

    out = psp_forward(feats, stage_w, bot_w, bot_b)
    out = jax.block_until_ready(out)

    ref = psp_reference(feats, stage_w, bot_w, bot_b)
    np.testing.assert_allclose(np.asarray(out), ref, atol=5e-2, rtol=5e-2)
    assert out.shape == (N, OUT_FEATURES, H, W)

    print("KERNEL_OK")
</pallas_src>

<mosaic_0001>
module attributes {stable_mosaic.version = 11 : i64} {
  func.func @_pool_stage_kernel(%arg0: i32, %arg1: i32, %arg2: memref<72x256xbf16, #tpu.memory_space<vmem>>, %arg3: memref<1x256x128xbf16, #tpu.memory_space<vmem>>, %arg4: memref<4x128x128xbf16, #tpu.memory_space<vmem>>, %arg5: memref<1x72x128xbf16, #tpu.memory_space<vmem>>, %arg6: memref<72x128xf32, #tpu.memory_space<vmem>>) attributes {dimension_semantics = [#tpu.dimension_semantics<parallel>, #tpu.dimension_semantics<arbitrary>], iteration_bounds = array<i64: 2, 1>, scalar_prefetch = 0 : i64, scratch_operands = 1 : i64, tpu.core_type = #tpu.core_type<tc>, window_params = [{transform_indices = @transform_0, window_bounds = array<i64: 72, 256>}, {transform_indices = @transform_1, window_bounds = array<i64: 1, 256, 128>}, {pipeline_mode = #tpu.pipeline_mode<synchronous>, transform_indices = @transform_2, window_bounds = array<i64: 4, 128, 128>}, {transform_indices = @transform_3, window_bounds = array<i64: 1, 72, 128>}]} {
    %c0_i32 = arith.constant 0 : i32
    %0 = arith.cmpi eq, %arg1, %c0_i32 : i32
    %1 = arith.extui %0 : i1 to i32
    %c0_i32_0 = arith.constant 0 : i32
    %2 = arith.cmpi ne, %1, %c0_i32_0 : i32
    scf.if %2 {
      %cst_11 = arith.constant 0.000000e+00 : f32
      %13 = vector.broadcast %cst_11 : f32 to vector<72x128xf32>
      %c0_12 = arith.constant 0 : index
      %c0_13 = arith.constant 0 : index
      %14 = vector.load %arg6[%c0_12, %c0_13] : memref<72x128xf32, #tpu.memory_space<vmem>>, vector<72x128xf32>
      tpu.vector_store %arg6[%c0_12, %c0_13], %13 {strides = array<i32>} : memref<72x128xf32, #tpu.memory_space<vmem>>, vector<72x128xf32>,
    } else {
    }
    %c0 = arith.constant 0 : index
    %c0_1 = arith.constant 0 : index
    %3 = vector.load %arg6[%c0, %c0_1] : memref<72x128xf32, #tpu.memory_space<vmem>>, vector<72x128xf32>
    %c0_2 = arith.constant 0 : index
    %c0_3 = arith.constant 0 : index
    %4 = vector.load %arg2[%c0_2, %c0_3] : memref<72x256xbf16, #tpu.memory_space<vmem>>, vector<72x256xbf16>
    %c0_4 = arith.constant 0 : index
    %c0_5 = arith.constant 0 : index
    %c0_6 = arith.constant 0 : index
    %5 = vector.load %arg3[%c0_4, %c0_5, %c0_6] : memref<1x256x128xbf16, #tpu.memory_space<vmem>>, vector<1x256x128xbf16>
    %6 = vector.shape_cast %5 : vector<1x256x128xbf16> to vector<256x128xbf16>
    %cst = arith.constant dense<0.000000e+00> : vector<72x128xf32>
    %7 = tpu.matmul %4, %6, %cst {dimension_numbers = #tpu.dot_dimension_numbers<[1], [0], [0], [1], [0, 0, 1, 1], [], []>} : vector<72x256xbf16>, vector<256x128xbf16>, vector<72x128xf32> -> vector<72x128xf32>
    %8 = arith.addf %3, %7 : vector<72x128xf32>
    %c0_7 = arith.constant 0 : index
    %c0_8 = arith.constant 0 : index
    %9 = vector.load %arg6[%c0_7, %c0_8] : memref<72x128xf32, #tpu.memory_space<vmem>>, vector<72x128xf32>
    tpu.vector_store %arg6[%c0_7, %c0_8], %8 {strides = array<i32>} : memref<72x128xf32, #tpu.memory_space<vmem>>, vector<72x128xf32>,
    %c0_i32_9 = arith.constant 0 : i32
    %10 = arith.cmpi eq, %arg1, %c0_i32_9 : i32
    %11 = arith.extui %10 : i1 to i32
    %c0_i32_10 = arith.constant 0 : i32
    %12 = arith.cmpi ne, %11, %c0_i32_10 : i32
    scf.if %12 {
      %c0_11 = arith.constant 0 : index
      %c0_12 = arith.constant 0 : index
      %13 = vector.load %arg6[%c0_11, %c0_12] : memref<72x128xf32, #tpu.memory_space<vmem>>, vector<72x128xf32>
      %14 = arith.truncf %13 : vector<72x128xf32> to vector<72x128xbf16>
      %15 = vector.extract_strided_slice %14 {offsets = [0, 0], sizes = [8, 128], strides = [1, 1]} : vector<72x128xbf16> to vector<8x128xbf16>
      %c0_13 = arith.constant 0 : index
      %c0_14 = arith.constant 0 : index
      %c0_15 = arith.constant 0 : index
      %16 = vector.load %arg4[%c0_13, %c0_14, %c0_15] : memref<4x128x128xbf16, #tpu.memory_space<vmem>>, vector<1x128x128xbf16>
      %17 = vector.shape_cast %16 : vector<1x128x128xbf16> to vector<128x128xbf16>
      %cst_16 = arith.constant dense<0.000000e+00> : vector<8x128xf32>
      %18 = tpu.matmul %15, %17, %cst_16 {dimension_numbers = #tpu.dot_dimension_numbers<[1], [0], [0], [1], [0, 0, 1, 1], [], []>} : vector<8x128xbf16>, vector<128x128xbf16>, vector<8x128xf32> -> vector<8x128xf32>
      %19 = arith.truncf %18 : vector<8x128xf32> to vector<8x128xbf16>
      %c0_17 = arith.constant 0 : index
      %c0_18 = arith.constant 0 : index
      %c0_19 = arith.constant 0 : index
      %20 = vector.load %arg5[%c0_17, %c0_18, %c0_19] : memref<1x72x128xbf16, #tpu.memory_space<vmem>>, vector<1x8x128xbf16>
      %21 = vector.shape_cast %20 : vector<1x8x128xbf16> to vector<8x128xbf16>
      %22 = vector.shape_cast %19 : vector<8x128xbf16> to vector<1x8x128xbf16>
      tpu.vector_store %arg5[%c0_17, %c0_18, %c0_19], %22 {strides = array<i32>} : memref<1x72x128xbf16, #tpu.memory_space<vmem>>, vector<1x8x128xbf16>,
      %23 = vector.extract_strided_slice %14 {offsets = [8, 0], sizes = [8, 128], strides = [1, 1]} : vector<72x128xbf16> to vector<8x128xbf16>
      %c1 = arith.constant 1 : index
      %c0_20 = arith.constant 0 : index
      %c0_21 = arith.constant 0 : index
      %24 = vector.load %arg4[%c1, %c0_20, %c0_21] : memref<4x128x128xbf16, #tpu.memory_space<vmem>>, vector<1x128x128xbf16>
      %25 = vector.shape_cast %24 : vector<1x128x128xbf16> to vector<128x128xbf16>
      %cst_22 = arith.constant dense<0.000000e+00> : vector<8x128xf32>
      %26 = tpu.matmul %23, %25, %cst_22 {dimension_numbers = #tpu.dot_dimension_numbers<[1], [0], [0], [1], [0, 0, 1, 1], [], []>} : vector<8x128xbf16>, vector<128x128xbf16>, vector<8x128xf32> -> vector<8x128xf32>
      %27 = arith.truncf %26 : vector<8x128xf32> to vector<8x128xbf16>
      %c0_23 = arith.constant 0 : index
      %c8 = arith.constant 8 : index
      %c0_24 = arith.constant 0 : index
      %28 = vector.load %arg5[%c0_23, %c8, %c0_24] : memref<1x72x128xbf16, #tpu.memory_space<vmem>>, vector<1x8x128xbf16>
      %29 = vector.shape_cast %28 : vector<1x8x128xbf16> to vector<8x128xbf16>
      %30 = vector.shape_cast %27 : vector<8x128xbf16> to vector<1x8x128xbf16>
      tpu.vector_store %arg5[%c0_23, %c8, %c0_24], %30 {strides = array<i32>} : memref<1x72x128xbf16, #tpu.memory_space<vmem>>, vector<1x8x128xbf16>,
      %31 = vector.extract_strided_slice %14 {offsets = [16, 0], sizes = [16, 128], strides = [1, 1]} : vector<72x128xbf16> to vector<16x128xbf16>
      %c2 = arith.constant 2 : index
      %c0_25 = arith.constant 0 : index
      %c0_26 = arith.constant 0 : index
      %32 = vector.load %arg4[%c2, %c0_25, %c0_26] : memref<4x128x128xbf16, #tpu.memory_space<vmem>>, vector<1x128x128xbf16>
      %33 = vector.shape_cast %32 : vector<1x128x128xbf16> to vector<128x128xbf16>
      %cst_27 = arith.constant dense<0.000000e+00> : vector<16x128xf32>
      %34 = tpu.matmul %31, %33, %cst_27 {dimension_numbers = #tpu.dot_dimension_numbers<[1], [0], [0], [1], [0, 0, 1, 1], [], []>} : vector<16x128xbf16>, vector<128x128xbf16>, vector<16x128xf32> -> vector<16x128xf32>
      %35 = arith.truncf %34 : vector<16x128xf32> to vector<16x128xbf16>
      %c0_28 = arith.constant 0 : index
      %c16 = arith.constant 16 : index
      %c0_29 = arith.constant 0 : index
      %36 = vector.load %arg5[%c0_28, %c16, %c0_29] : memref<1x72x128xbf16, #tpu.memory_space<vmem>>, vector<1x16x128xbf16>
      %37 = vector.shape_cast %36 : vector<1x16x128xbf16> to vector<16x128xbf16>
      %38 = vector.shape_cast %35 : vector<16x128xbf16> to vector<1x16x128xbf16>
      tpu.vector_store %arg5[%c0_28, %c16, %c0_29], %38 {strides = array<i32>} : memref<1x72x128xbf16, #tpu.memory_space<vmem>>, vector<1x16x128xbf16>,
      %39 = vector.extract_strided_slice %14 {offsets = [32, 0], sizes = [40, 128], strides = [1, 1]} : vector<72x128xbf16> to vector<40x128xbf16>
      %c3 = arith.constant 3 : index
      %c0_30 = arith.constant 0 : index
      %c0_31 = arith.constant 0 : index
      %40 = vector.load %arg4[%c3, %c0_30, %c0_31] : memref<4x128x128xbf16, #tpu.memory_space<vmem>>, vector<1x128x128xbf16>
      %41 = vector.shape_cast %40 : vector<1x128x128xbf16> to vector<128x128xbf16>
      %cst_32 = arith.constant dense<0.000000e+00> : vector<40x128xf32>
      %42 = tpu.matmul %39, %41, %cst_32 {dimension_numbers = #tpu.dot_dimension_numbers<[1], [0], [0], [1], [0, 0, 1, 1], [], []>} : vector<40x128xbf16>, vector<128x128xbf16>, vector<40x128xf32> -> vector<40x128xf32>
      %43 = arith.truncf %42 : vector<40x128xf32> to vector<40x128xbf16>
      %c0_33 = arith.constant 0 : index
      %c32 = arith.constant 32 : index
      %c0_34 = arith.constant 0 : index
      %44 = vector.load %arg5[%c0_33, %c32, %c0_34] : memref<1x72x128xbf16, #tpu.memory_space<vmem>>, vector<1x40x128xbf16>
      %45 = vector.shape_cast %44 : vector<1x40x128xbf16> to vector<40x128xbf16>
      %46 = vector.shape_cast %43 : vector<40x128xbf16> to vector<1x40x128xbf16>
      tpu.vector_store %arg5[%c0_33, %c32, %c0_34], %46 {strides = array<i32>} : memref<1x72x128xbf16, #tpu.memory_space<vmem>>, vector<1x40x128xbf16>,
    } else {
    }
    return
  }
  func.func @transform_0(%arg0: i32, %arg1: i32) -> (i32, i32) {
    %c0_i32 = arith.constant 0 : i32
    %c0_i32_0 = arith.constant 0 : i32
    return %c0_i32, %arg1 : i32, i32
  }
  func.func @transform_1(%arg0: i32, %arg1: i32) -> (i32, i32, i32) {
    %c0_i32 = arith.constant 0 : i32
    %c0_i32_0 = arith.constant 0 : i32
    return %arg0, %arg1, %c0_i32 : i32, i32, i32
  }
  func.func @transform_2(%arg0: i32, %arg1: i32) -> (i32, i32, i32) {
    %c0_i32 = arith.constant 0 : i32
    %c0_i32_0 = arith.constant 0 : i32
    %c0_i32_1 = arith.constant 0 : i32
    %c0_i32_2 = arith.constant 0 : i32
    return %c0_i32, %c0_i32_0, %c0_i32_1 : i32, i32, i32
  }
  func.func @transform_3(%arg0: i32, %arg1: i32) -> (i32, i32, i32) {
    %c0_i32 = arith.constant 0 : i32
    %c0_i32_0 = arith.constant 0 : i32
    %c0_i32_1 = arith.constant 0 : i32
    return %arg0, %c0_i32, %c0_i32_0 : i32, i32, i32
  }
}

</mosaic_0001>

<bundles_post_ra>
// kernel: tpu_custom_call.1
= control target key start
LH: loop header
LB: loop body
LE: loop exit
PB: predicated region body
PF: predicated region fallthrough
CT: control target
= control target key end

     0   :  { %s2063_s0 = inlined_call_operand.hbm [shape: bf16[72,256], index: 0, kind: input, shape index: {}]   ;;  %s2064_s1 = inlined_call_operand.hbm [shape: bf16[2,256,128], index: 1, kind: input, shape index: {}]   ;;  %s2065_s2 = inlined_call_operand.hbm [shape: bf16[4,128,128], index: 2, kind: input, shape index: {}]   ;;  %s2066_s3 = inlined_call_operand.hbm [shape: bf16[2,72,128], index: 3, kind: output, shape index: {}]  }
   0x1   :  { %2071 = sst [smem:[#allocation14_spill]] %s2063_s0 }
   0x2   :  { %2072 = sst [smem:[#allocation15_spill]] %s2065_s2 }
   0x3   :  { %8 = vsyncpa [#allocation4], 0 }
   0x4   :  { %9 = vsyncpa [#allocation7], 0 }
   0x5   :  { %11 = vsyncpa [#allocation7 + $0x1], 0 }
   0x6   :  { %12 = vsyncpa [#allocation5], 0 }
   0x7   :  { %14 = vsyncpa [#allocation5 + $0x1], 0  ;;  %s1794_s12 = smov 0   ;;  %s1796_s13 = smov 0  }
   0x8   :  { %s1798_s14 = smov 0   ;;  %s1800_s15 = smov 0  }
   0x9   :  { %s1802_s16 = smov 0   ;;  %s1804_s17 = smov 0  }
   0xa LB: > { %s1825_s18 = sadd.s32 4294967295, %s1760_s17   ;;  %s1159_s19 = sadd.s32 4294967294, %s1760_s17   ;;  %s1760_s17 = sphi %s1804_s17, %s20_s17   ;;  %s1756_s16 = sphi %s1802_s16, %s2095_s16   ;;  %s1752_s15 = sphi %s1800_s15, %s2094_s15   ;;  %s1748_s14 = sphi %s1798_s14, %s2093_s14   ;;  %s1744_s13 = sphi %s1796_s13, %s2092_s13   ;;  %s1740_s12 = sphi %s1794_s12, %s2091_s12  }
   0xb   : > { %p74_p0 = scmp.ne.s32.totalorder %s1748_s14, %s1744_s13  ;;  %p75_p1 = scmp.eq.s32.totalorder %s1760_s17, 0 }
   0xc   : > { %p80_p2 = scmp.ne.s32.totalorder %s1744_s13, %s1740_s12  ;;  %p2067_p3 = scmp.eq.s32.totalorder %s1825_s18, 0 }
   0xd   : > { %p1834_p4 = por %p75_p1, %p74_p0  ;;  %p125_p5 = scmp.eq.s32.totalorder %s1825_s18, 1 }
   0xe   : > { %p1841_p6 = por %p2067_p3, %p80_p2  ;;  %p131_p7 = scmp.eq.s32.totalorder %s1159_s19, 1 }
   0xf   : > { %p1845_p8 = por %p125_p5, %p74_p0  ;;  %p1160_p9 = scmp.ge.s32.totalorder %s1760_s17, 1 }
  0x10   : > { %p1850_p10 = por %p131_p7, %p80_p2  ;;  %p138_p11 = scmp.lt.s32.totalorder %s1760_s17, 3 }
  0x11   : > { %s2075_s22 = scalar_select %p1845_p8, 1, 0 }
  0x12   : > { %s2076_s23 = scalar_select %p1850_p10, 1, 0 }
  0x13   : > { %p1855_p12 = pnand %p1160_p9, %p138_p11  ;;  %s1762_s25 = smov [#allocation8]  }
  0x14   : > { %s166_s26 = sshll.u32 %s1762_s25, 4  ;;  %p1468_p1 = scmp.lt.s32.totalorder %s1760_s17, 2  ;;  %s167_s26 = int_to_ptr.vmem [resolvable:$true] %s166_s26 }
  0x15   : > { %p1451_p13 = pneg %p1855_p12  ;;  %s1603_s29 = scalar_lea.vmem %s167_s26, 4096 }
  0x16   : > { %p1871_p2 = pnand %p1468_p1, %p1834_p4  ;;  %p1604_p9 = scmp.ne.s32.totalorder %s167_s26, %s1603_s29 }
  0x17   : > { %p1865_p5 = pnand %p1451_p13, %p2067_p3  ;;  %p1611_p10 = scmp.lt.s32.totalorder %s167_s26, %s167_s26 }
  0x18   : > { %p1612_p13 = scmp.lt.s32.totalorder %s1603_s29, %s1603_s29 }
  0x19   : > { %p1594_p7 = pneg %p1865_p5 }
  0x1a   : > { %p1613_p3 = por %p1612_p13, %p1611_p10 }
  0x1b   : > { %p1606_p11 = pnand %p1604_p9, %p1594_p7 }
  0x1d   : > { %p1607_p0 = pneg %p1606_p11 }
  0x1f   : > { %p1614_p8 = pnand %p1613_p3, %p1607_p0 }
  0x21   : > { %1617 = shalt.err (!%p1614_p8)
}
  0x22   : > { %s2069_s30 = smov 64   ;;  %s2070_s4 = smov 4  }
  0x23   : > { %s2080_s2 = sld [smem:[#allocation15_spill]]  ;;  %s1765_s7 = smov [#allocation3]  }
  0x24   : > { %s153_s8 = sshll.u32 %s1765_s7, 4  ;;  %s154_s8 = int_to_ptr.vmem [resolvable:$true] %s153_s8 }
  0x25   : > { %s1629_s9 = scalar_lea.vmem %s154_s8, 1152  ;;  %p1637_p10 = scmp.lt.s32.totalorder %s154_s8, %s154_s8 }
  0x26   : > { %p1630_p4 = scmp.ne.s32.totalorder %s154_s8, %s1629_s9  ;;  %p1638_p0 = scmp.lt.s32.totalorder %s1629_s9, %s1629_s9 }
  0x28   : > { %p1632_p3 = pnand %p1630_p4, %p1594_p7  ;;  %p1639_p1 = por %p1638_p0, %p1637_p10 }
  0x29   : > { %1457 = dma.hbm_to_vmem [thread:$0]  (!%p1865_p5), %s2080_s2, 4096, %s167_s26, [#allocation7], %s2069_s30, %s2069_s30, %s2070_s4  }
  0x2a   : > { %p1633_p8 = pneg %p1632_p3 }
  0x2c   : > { %p1640_p9 = pnand %p1639_p1, %p1633_p8 }
  0x2e   : > { %1643 = shalt.err (!%p1640_p9)
}
  0x2f   : > { %s1766_s10 = smov 128   ;;  %s1767_s11 = smov 8  }
  0x30   : > { %s2081_s0 = sld [smem:[#allocation14_spill]]  ;;  %s67_s25 = sadd.s32 1, %s1748_s14 }
  0x31   : > { %s32_s26 = sadd.s32 1, %s1756_s16  ;;  %s180_s29 = sand.u32 1, %s1760_s17  }
  0x32   : > { %p34_p7 = scmp.ge.s32.totalorder %s32_s26, 2  ;;  %s182_s5 = sand.u32 1, %s1748_s14  }
  0x33   : > { %s1239_s6 = sshll.u32 %s1756_s16, 11  ;;  %s1164_s7 = sshll.u32 %s182_s5, 7 }
  0x34   : > { %s2097_s26 = smov (%p34_p7, %s32_s26), 0  ;;  %s192_s27 = scalar_lea.hbm %s2064_s1, %s1239_s6 }
  0x35   : > { %s62_s4 = ssub.s32 %s1756_s16, %s2097_s26  ;;  %s184_s19 = scalar_lea.vmem [#allocation6], %s1164_s7 }
  0x36   : > { %1454 = dma.hbm_to_vmem [thread:$0]  (!%p1865_p5), %s2081_s0, 1152, %s154_s8, [#allocation4], %s1766_s10, %s1766_s10, %s1767_s11  }
  0x37   : > { %p65_p11 = scmp.eq.s32.totalorder %s62_s4, 0  ;;  %s193_s20 = sshll.u32 %s184_s19, 4  ;;  %s194_s20 = int_to_ptr.vmem [resolvable:$true] %s193_s20 }
  0x38   : > { %s181_s10 = scalar_lea.sflag [#allocation7], %s180_s29  ;;  %p1646_p5 = pneg %p1871_p2 }
  0x39   : > { %s1909_s8 = scalar_select %p65_p11, %s1748_s14, %s67_s25  }
  0x3a   : > { %s1657_s11 = scalar_lea.vmem %s194_s20, 2048  ;;  %s1768_s0 = smov [#allocation6]  }
  0x3b   : > { %p1658_p13 = scmp.ne.s32.totalorder %s194_s20, %s1657_s11  ;;  %s1662_s5 = sshll.u32 %s1768_s0, 4  ;;  %s1663_s5 = int_to_ptr.vmem [resolvable:$false] %s1662_s5 }
  0x3c   : > { %s1664_s2 = scalar_lea.vmem %s1663_s5, 4096  ;;  %p1665_p8 = scmp.lt.s32.totalorder %s194_s20, %s1663_s5 }
  0x3d   : > { %p1660_p4 = pnand %p1658_p13, %p1646_p5  ;;  %p1666_p10 = scmp.lt.s32.totalorder %s1664_s2, %s1657_s11 }
  0x3f   : > { %p1661_p3 = pneg %p1660_p4  ;;  %p1667_p0 = por %p1666_p10, %p1665_p8 }
  0x41   : > { %p1668_p1 = pnand %p1667_p0, %p1661_p3 }
  0x43   : > { %1671 = shalt.err (!%p1668_p1)
}
  0x44   : > { %s2082_s30 = smov 4   ;;  %s2083_s4 = smov 64  }
  0x45   : > { %1461 = dma.hbm_to_vmem [thread:$0]  (!%p1871_p2), %s192_s27, 2048, %s194_s20, %s181_s10, %s2083_s4, %s2083_s4, %s2082_s30  }
  0x46   : > { %205 = sbr.rel (%p1855_p12) target bundleno = 579 (0x243), region = 32  ;;  %p2084_p9 = scmp.eq.s32.totalorder (!%p1855_p12), %s1825_s18, 0 }
  0x4b   : > { %1723 = dma.done.wait (%p2084_p9), [#allocation4], 1152   ;;  %p2085_p7 = pmov %p2084_p9 }
  0x4c   : > { %s211_s0 = sand.u32 1, %s1825_s18   ;;  %s1926_s2 = sand.u32 1, %s1744_s13  }
  0x4d   : > { %1725 = vsyncadd (%p2085_p7), [#allocation4], 4294966144  ;;  %s1169_s28 = sshll.u32 %s1926_s2, 7  ;;  %s212_s25 = scalar_lea.sflag [#allocation7], %s211_s0 }
  0x4e   : > { %s1929_s29 = scalar_lea.vmem [#allocation6], %s1169_s28 }
  0x4f   : > { %1727 = dma.done.wait (%p1841_p6), %s212_s25, 2048  }
  0x50   : > { %1729 = vsyncadd (%p1841_p6), %s212_s25, 4294965248  ;;  %p2086_p12 = pmov %p2085_p7 }
  0x51   : > { %p2087_p2 = pmov %p2085_p7 }
  0x52   : > { %1731 = dma.done.wait (%p2086_p12), [#allocation7], 4096  }
  0x53   : > { %1733 = vsyncadd (%p2087_p2), [#allocation7], 4294963200  ;;  %v1769_v0 = vmov 0.0   ;;  %v1530_v1 = vld [vmem:[%s1929_s29 + $0x78] sm:$0xff]   ;;  %v1532_v3 = vld [vmem:[%s1929_s29 + $0x70] sm:$0xff]   ;;  %vm1770_vm0 = vmmov 0  }
  0x54   : > { %1369 = vmatprep.subr.bf16.mxu1 %v1769_v0  ;;  %v1531_v2 = vld [vmem:[%s1929_s29 + $0x38] sm:$0xff]   ;;  %1265 = vmatprep.subr.bf16.mxu0 %v1530_v1  ;;  %v1533_v4 = vld [vmem:[%s1929_s29 + $0x30] sm:$0xff]   ;;  %v1534_v5 = vld [vmem:[%s1929_s29 + $0x68] sm:$0xff]   ;;  %s1437_s18 = smul.u32 36, %s1926_s2  ;;  %s1038_s19 = scalar_lea.sflag [#allocation5], %s1926_s2 }
  0x55   : > { %1266 = vmatpush3.bf16.msra.mxu0 %v1531_v2  ;;  %v1535_v6 = vld [vmem:[%s1929_s29 + $0x28] sm:$0xff]   ;;  %v1536_v7 = vld [vmem:[%s1929_s29 + $0x60] sm:$0xff]   ;;  %v1538_v9 = vld [vmem:[%s1929_s29 + $0x58] sm:$0xff]   ;;  %1385 = vmatprep.mubr.msk.bf16.mxu1 %vm1770_vm0, %v1769_v0  ;;  %s1438_s6 = smul.u32 576, %s1752_s15  ;;  %p2088_p11 = scmp.ne.s32.totalorder %s2075_s22, 0 }
  0x56   : > { %1267 = vmatprep.subr.bf16.mxu0 %v1532_v3  ;;  %v1537_v8 = vld [vmem:[%s1929_s29 + $0x20] sm:$0xff]   ;;  %v1539_v10 = vld [vmem:[%s1929_s29 + $0x18] sm:$0xff]   ;;  %v1540_v11 = vld [vmem:[%s1929_s29 + $0x50] sm:$0xff]   ;;  %s2000_s21 = scalar_lea.vmem [#allocation9], %s1437_s18  ;;  %s1771_s20 = smov [#allocation9]  }
  0x57   : > { %v1548_v12 = vld [vmem:[#allocation3 + $0x4] ss:$8 sps:$4 sm:$0xff]   ;;  %v1541_v13 = vld [vmem:[%s1929_s29 + $0x10] sm:$0xff]   ;;  %v1542_v14 = vld [vmem:[%s1929_s29 + $0x48] sm:$0xff]   ;;  %s1051_s24 = sshll.u32 %s2000_s21, 4  ;;  %s2014_s27 = scalar_lea.hbm %s2066_s3, %s1438_s6  ;;  %s2008_s24 = int_to_ptr.vmem [resolvable:$true] %s1051_s24 }
  0x58   : > { %483 = vmatprep.mubr.bf16.mxu0 %v1548_v12  ;;  %v1543_v15 = vld [vmem:[%s1929_s29 + $0x8] sm:$0xff]   ;;  %v1561_v16 = vld [vmem:[#allocation8 + $0x78] sm:$0xff]   ;;  %v1544_v17 = vld [vmem:[%s1929_s29 + $0x40] sm:$0xff]   ;;  %s1672_s15 = scalar_lea.vmem %s2008_s24, 576  ;;  %s1676_s10 = sshll.u32 %s1771_s20, 4  ;;  %s1677_s10 = int_to_ptr.vmem [resolvable:$false] %s1676_s10 }
  0x59   : > { %1268 = vmatpush3.bf16.msra.mxu0 %v1533_v4  ;;  %1370 = vmatpush3.bf16.msra.mxu1 %v1561_v16  ;;  %v1563_v18 = vld [vmem:[#allocation8 + $0x70] sm:$0xff]   ;;  %v1545_v19 = vld [vmem:[%s1929_s29] sm:$0xff]   ;;  %v1565_v21 = vld [vmem:[#allocation8 + $0x68] sm:$0xff]   ;;  %p1673_p6 = scmp.ne.s32.totalorder %s2008_s24, %s1672_s15  ;;  %s1678_s11 = scalar_lea.vmem %s1677_s10, 1152 }
  0x5a   : > { %1269 = vmatprep.subr.bf16.mxu0 %v1534_v5  ;;  %1371 = vmatprep.subr.bf16.mxu1 %v1769_v0  ;;  %v1546_v20 = vld [vmem:[#allocation3] ss:$8 sps:$4 sm:$0xff]   ;;  %v1549_v22 = vld [vmem:[#allocation3 + $0x14] ss:$8 sps:$4 sm:$0xff]   ;;  %v1551_v27 = vld [vmem:[#allocation3 + $0x10] ss:$8 sps:$4 sm:$0xff]   ;;  %p1679_p4 = scmp.lt.s32.totalorder %s2008_s24, %s1677_s10  ;;  %p1680_p3 = scmp.lt.s32.totalorder %s1678_s11, %s1672_s15 }
  0x5b   : > { %v1560_v23 = vld [vmem:[#allocation8 + $0x38] sm:$0xff]   ;;  %v1567_v24 = vld [vmem:[#allocation8 + $0x60] sm:$0xff]   ;;  %v1562_v25 = vld [vmem:[#allocation8 + $0x30] sm:$0xff]   ;;  %p1674_p5 = pnand %p1673_p6, %p2088_p11 }
  0x5c   : > { %v1569_v26 = vld [vmem:[#allocation8 + $0x58] sm:$0xff]   ;;  %v1564_v29 = vld [vmem:[#allocation8 + $0x28] sm:$0xff]   ;;  %v1566_v30 = vld [vmem:[#allocation8 + $0x20] sm:$0xff]   ;;  %p1681_p8 = por %p1680_p3, %p1679_p4 }
  0x5d   : > { %1270 = vmatpush3.bf16.msra.mxu0 %v1535_v6  ;;  %1372 = vmatpush3.bf16.msra.mxu1 %v1563_v18  ;;  %v1552_v28 = vld [vmem:[#allocation3 + $0x24] ss:$8 sps:$4 sm:$0xff]   ;;  %v1554_v31 = vld [vmem:[#allocation3 + $0x20] ss:$8 sps:$4 sm:$0xff]   ;;  %v1555_v32 = vld [vmem:[#allocation3 + $0x34] ss:$8 sps:$4 sm:$0xff]   ;;  %p1675_p13 = pneg %p1674_p5 }
  0x5e   : > { %1271 = vmatprep.subr.bf16.mxu0 %v1536_v7  ;;  %1373 = vmatprep.subr.bf16.mxu1 %v1769_v0  ;;  %v1568_v33 = vld [vmem:[#allocation8 + $0x18] sm:$0xff]   ;;  %v1570_v34 = vld [vmem:[#allocation8 + $0x10] sm:$0xff]   ;;  %v1572_v40 = vld [vmem:[#allocation8 + $0x8] sm:$0xff]  }
  0x5f   : > { %v275_v35 = vld [vmem:[#allocation3 + $0x40] sm:$0xff]  ;;  %v1557_v36 = vld [vmem:[#allocation3 + $0x30] ss:$8 sps:$4 sm:$0xff]   ;;  %v1574_v42 = vld [vmem:[#allocation8] sm:$0xff]   ;;  %p1682_p10 = pnand %p1681_p8, %p1675_p13 }
  0x60   : > { %v1180_v37 = vcombine.high %v275_v35, %v275_v35  ;;  %v1179_v38 = vcombine.low %v275_v35, %v275_v35  ;;  %v1571_v39 = vld [vmem:[#allocation8 + $0x50] sm:$0xff]   ;;  %v1573_v41 = vld [vmem:[#allocation8 + $0x48] sm:$0xff]   ;;  %v1575_v43 = vld [vmem:[#allocation8 + $0x40] sm:$0xff]  }
  0x61   : > { %1272 = vmatpush3.bf16.msra.mxu0 %v1537_v8  ;;  %1374 = vmatpush3.bf16.msra.mxu1 %v1565_v21  ;;  %v1576_v50 = vld [vmem:[#allocation8 + $0xb8] sm:$0xff]   ;;  %v1578_v56 = vld [vmem:[#allocation8 + $0xb0] sm:$0xff]   ;;  %v1580_v60 = vld [vmem:[#allocation8 + $0xa8] sm:$0xff]  }
  0x62   : > { %1273 = vmatprep.subr.bf16.mxu0 %v1538_v9  ;;  %1375 = vmatprep.subr.bf16.mxu1 %v1769_v0  ;;  %v1577_v53 = vld [vmem:[#allocation8 + $0xf8] sm:$0xff]   ;;  %v1579_v58 = vld [vmem:[#allocation8 + $0xf0] sm:$0xff]   ;;  %v1581_v62 = vld [vmem:[#allocation8 + $0xe8] sm:$0xff]  }
  0x63   : > { %v1582_v1 = vld [vmem:[#allocation8 + $0xa0] sm:$0xff]   ;;  %v1584_v5 = vld [vmem:[#allocation8 + $0x98] sm:$0xff]   ;;  %v1586_v9 = vld [vmem:[#allocation8 + $0x90] sm:$0xff]  }
  0x64   : > { %v1583_v3 = vld [vmem:[#allocation8 + $0xe0] sm:$0xff]   ;;  %v1585_v7 = vld [vmem:[#allocation8 + $0xd8] sm:$0xff]  }
  0x65   : > { %1274 = vmatpush3.bf16.msra.mxu0 %v1539_v10  ;;  %1376 = vmatpush3.bf16.msra.mxu1 %v1567_v24  ;;  %v1591_v21 = vld [vmem:[#allocation8 + $0xc0] sm:$0xff]  }
  0x66   : > { %1275 = vmatprep.subr.bf16.mxu0 %v1540_v11  ;;  %1377 = vmatprep.subr.bf16.mxu1 %v1769_v0  ;;  %v1587_v11 = vld [vmem:[#allocation8 + $0xd0] sm:$0xff]  }
  0x69   : > { %1276 = vmatpush3.bf16.msra.mxu0 %v1541_v13  ;;  %1378 = vmatpush3.bf16.msra.mxu1 %v1569_v26  ;;  %v1588_v13 = vld [vmem:[#allocation8 + $0x88] sm:$0xff]  }
  0x6a   : > { %1277 = vmatprep.subr.bf16.mxu0 %v1542_v14  ;;  %1379 = vmatprep.subr.bf16.mxu1 %v1769_v0 }
  0x6d   : > { %1278 = vmatpush3.bf16.msra.mxu0 %v1543_v15  ;;  %1380 = vmatpush3.bf16.msra.mxu1 %v1571_v39  ;;  %v1589_v15 = vld [vmem:[#allocation8 + $0xc8] sm:$0xff]  }
  0x6e   : > { %1279 = vmatprep.subr.bf16.mxu0 %v1544_v17  ;;  %1381 = vmatprep.subr.bf16.mxu1 %v1769_v0  ;;  %v1590_v17 = vld [vmem:[#allocation8 + $0x80] sm:$0xff]  }
  0x71   : > { %1280 = vmatpush3.bf16.msra.mxu0 %v1545_v19  ;;  %1382 = vmatpush3.bf16.msra.mxu1 %v1573_v41 }
  0x72   : > { %1349 = vmatprep.subr.bf16.mxu0 %v1769_v0  ;;  %1383 = vmatprep.subr.bf16.mxu1 %v1769_v0 }
  0x74   : > { %484 = vmatmul.mubr.bf16.vlgmr.msra.gmra.mxu0 %v1546_v20 }
  0x75   : > { %491 = vmatprep.mubr.bf16.mxu0 %v1549_v22  ;;  %1350 = vmatpush3.bf16.msra.mxu0 %v1560_v23 }
  0x76   : > { %1351 = vmatprep.subr.bf16.mxu0 %v1769_v0  ;;  %1384 = vmatpush3.bf16.msra.mxu1 %v1575_v43 }
  0x77   : > { %1409 = vmatprep.subr.bf16.mxu1 %v1769_v0 }
  0x79   : > { %1352 = vmatpush3.bf16.msra.mxu0 %v1562_v25 }
  0x7a   : > { %1353 = vmatprep.subr.bf16.mxu0 %v1769_v0 }
  0x7c   : > { %492 = vmatmul.mubr.bf16.gmra.mxu0 %v1551_v27 }
  0x7d   : > { %499 = vmatprep.mubr.bf16.mxu0 %v1552_v28  ;;  %1354 = vmatpush3.bf16.msra.mxu0 %v1564_v29 }
  0x7e   : > { %1355 = vmatprep.subr.bf16.mxu0 %v1769_v0 }
  0x81   : > { %1356 = vmatpush3.bf16.msra.mxu0 %v1566_v30 }
  0x82   : > { %1357 = vmatprep.subr.bf16.mxu0 %v1769_v0 }
  0x84   : > { %500 = vmatmul.mubr.bf16.gmra.mxu0 %v1554_v31 }
  0x85   : > { %507 = vmatprep.mubr.bf16.mxu0 %v1555_v32  ;;  %1358 = vmatpush3.bf16.msra.mxu0 %v1568_v33 }
  0x86   : > { %1359 = vmatprep.subr.bf16.mxu0 %v1769_v0 }
  0x89   : > { %1360 = vmatpush3.bf16.msra.mxu0 %v1570_v34 }
  0x8a   : > { %1361 = vmatprep.subr.bf16.mxu0 %v1769_v0 }
  0x8c   : > { %508 = vmatmul.mubr.bf16.gmra.mxu0 %v1557_v36 }
  0x8d   : > { %515 = vmatprep.mubr.bf16.mxu0 %v1180_v37  ;;  %1362 = vmatpush3.bf16.msra.mxu0 %v1572_v40 }
  0x8e   : > { %1363 = vmatprep.subr.bf16.mxu0 %v1769_v0 }
  0x91   : > { %1364 = vmatpush3.bf16.msra.mxu0 %v1574_v42 }
  0x92   : > { %1389 = vmatprep.subr.bf16.mxu0 %v1769_v0 }
  0x94   : > { %516 = vmatmul.mubr.bf16.gmra.mxu0 %v1179_v38 }
  0x95   : > { %1365 = vmatprep.mubr.msk.bf16.mxu0 %vm1770_vm0, %v1769_v0 }
 0x134   : > { %v1281_v44 = vpop.f32.mrf.mxu0 }
 0x136   : > { %v1282_v45 = vpop.f32.mrf.mxu0 }
 0x137   : > { %v1283_v48 = vadd.f32 %v1282_v45, %v1281_v44 }
 0x138   : > { %v1284_v46 = vpop.f32.mrf.mxu0 }
 0x13a   : > { %v1285_v47 = vpop.f32.mrf.mxu0 }
 0x13b   : > { %v1286_v49 = vadd.f32 %v1285_v47, %v1284_v46 }
 0x13c   : > { %v1287_v51 = vpop.f32.mrf.mxu0 }
 0x13d   : > { %v553_v52 = vpack.c.bf16 %v1286_v49, %v1283_v48 }
 0x13e   : > { %v1288_v54 = vpop.f32.mrf.mxu0 }
 0x13f   : > { %1366 = vmatmul.mubr.bf16.vlgmr.msra.gmra.mxu0 %v553_v52  ;;  %v682_v55 = vrot.slane %v553_v52, 4  ;;  %v1289_v19 = vadd.f32 %v1288_v54, %v1287_v51 }
 0x140   : > { %1390 = vmatpush3.bf16.msra.mxu0 %v1576_v50  ;;  %v1290_v57 = vpop.f32.mrf.mxu0  ;;  %1405 = vmatprep.mubr.msk.bf16.mxu0 %vm1770_vm0, %v1769_v0 }
 0x141   : > { %1386 = vmatmul.mubr.bf16.vlgmr.msra.gmra.mxu1 %v682_v55  ;;  %1391 = vmatprep.subr.bf16.mxu0 %v1769_v0 }
 0x142   : > { %1410 = vmatpush3.bf16.msra.mxu1 %v1577_v53  ;;  %v1291_v59 = vpop.f32.mrf.mxu0  ;;  %1425 = vmatprep.mubr.msk.bf16.mxu1 %vm1770_vm0, %v1769_v0 }
 0x143   : > { %1411 = vmatprep.subr.bf16.mxu1 %v1769_v0  ;;  %v1292_v20 = vadd.f32 %v1291_v59, %v1290_v57 }
 0x144   : > { %1392 = vmatpush3.bf16.msra.mxu0 %v1578_v56  ;;  %v1293_v61 = vpop.f32.mrf.mxu0 }
 0x145   : > { %1393 = vmatprep.subr.bf16.mxu0 %v1769_v0  ;;  %v554_v25 = vpack.c.bf16 %v1292_v20, %v1289_v19 }
 0x146   : > { %1412 = vmatpush3.bf16.msra.mxu1 %v1579_v58  ;;  %v1294_v63 = vpop.f32.mrf.mxu0 }
 0x147   : > { %1413 = vmatprep.subr.bf16.mxu1 %v1769_v0  ;;  %v1295_v23 = vadd.f32 %v1294_v63, %v1293_v61 }
 0x148   : > { %1394 = vmatpush3.bf16.msra.mxu0 %v1580_v60  ;;  %v1296_v2 = vpop.f32.mrf.mxu0 }
 0x149   : > { %1395 = vmatprep.subr.bf16.mxu0 %v1769_v0 }
 0x14a   : > { %1414 = vmatpush3.bf16.msra.mxu1 %v1581_v62  ;;  %v1297_v4 = vpop.f32.mrf.mxu0 }
 0x14b   : > { %1415 = vmatprep.subr.bf16.mxu1 %v1769_v0  ;;  %v1298_v24 = vadd.f32 %v1297_v4, %v1296_v2 }
 0x14c   : > { %1396 = vmatpush3.bf16.msra.mxu0 %v1582_v1  ;;  %v1299_v6 = vpop.f32.mrf.mxu0 }
 0x14d   : > { %1397 = vmatprep.subr.bf16.mxu0 %v1769_v0  ;;  %v555_v26 = vpack.c.bf16 %v1298_v24, %v1295_v23 }
 0x14e   : > { %1416 = vmatpush3.bf16.msra.mxu1 %v1583_v3  ;;  %v1300_v8 = vpop.f32.mrf.mxu0 }
 0x14f   : > { %1417 = vmatprep.subr.bf16.mxu1 %v1769_v0  ;;  %v1301_v27 = vadd.f32 %v1300_v8, %v1299_v6 }
 0x150   : > { %1398 = vmatpush3.bf16.msra.mxu0 %v1584_v5  ;;  %v1302_v10 = vpop.f32.mrf.mxu0 }
 0x151   : > { %1399 = vmatprep.subr.bf16.mxu0 %v1769_v0 }
 0x152   : > { %1418 = vmatpush3.bf16.msra.mxu1 %v1585_v7  ;;  %v1303_v12 = vpop.f32.mrf.mxu0 }
 0x153   : > { %1419 = vmatprep.subr.bf16.mxu1 %v1769_v0  ;;  %v1304_v28 = vadd.f32 %v1303_v12, %v1302_v10 }
 0x154   : > { %1400 = vmatpush3.bf16.msra.mxu0 %v1586_v9  ;;  %v1305_v14 = vpop.f32.mrf.mxu0 }
 0x155   : > { %1401 = vmatprep.subr.bf16.mxu0 %v1769_v0  ;;  %v556_v29 = vpack.c.bf16 %v1304_v28, %v1301_v27 }
 0x156   : > { %1420 = vmatpush3.bf16.msra.mxu1 %v1587_v11  ;;  %v1306_v16 = vpop.f32.mrf.mxu0 }
 0x157   : > { %1421 = vmatprep.subr.bf16.mxu1 %v1769_v0  ;;  %v1307_v30 = vadd.f32 %v1306_v16, %v1305_v14 }
 0x158   : > { %1402 = vmatpush3.bf16.msra.mxu0 %v1588_v13  ;;  %v1308_v18 = vpop.f32.mrf.mxu0 }
 0x159   : > { %1403 = vmatprep.subr.bf16.mxu0 %v1769_v0  ;;  %v557_v31 = vpack.c.bf16 %v1307_v30, %v1307_v30 }
 0x15a   : > { %1422 = vmatpush3.bf16.msra.mxu1 %v1589_v15  ;;  %v1309_v22 = vpop.f32.mrf.mxu0 }
 0x15b   : > { %1423 = vmatprep.subr.bf16.mxu1 %v1769_v0 }
 0x15c   : > { %1404 = vmatpush3.bf16.msra.mxu0 %v1590_v17 }
 0x15e   : > { %1424 = vmatpush3.bf16.msra.mxu1 %v1591_v21 }
 0x15f   : > { %1406 = vmatmul.mubr.bf16.vlgmr.msra.gmra.mxu0 %v554_v25 }
 0x161   : > { %1426 = vmatmul.mubr.bf16.vlgmr.msra.gmra.mxu1 %v555_v26 }
 0x162   : > { %1429 = vmatprep.mubr.msk.bf16.mxu1 %vm1770_vm0, %v1769_v0 }
 0x169   : > { %1430 = vmatmul.mubr.bf16.gmra.mxu1 %v556_v29 }
 0x16a   : > { %1433 = vmatprep.mubr.msk.bf16.mxu1 %vm1770_vm0, %v1769_v0 }
 0x171   : > { %1434 = vmatmul.mubr.bf16.gmra.mxu1 %v557_v31 }
 0x1ff   : > { %v656_v32 = vpop.f32.mrf.mxu0 }
 0x200   : > { %v662_v33 = vpack.c.bf16 %v656_v32, %v656_v32 }
 0x201   : > { %v1367_v34 = vpop.f32.mrf.mxu0  ;;  %v766_v35 = vpop.f32.mrf.mxu1 }
 0x202   : > { %663 = vst [vmem:[%s2000_s21] sm:$0xf] %v662_v33  ;;  %v772_v36 = vpack.c.bf16 %v766_v35, %v766_v35 }
 0x203   : > { %v659_v37 = vpop.f32.mrf.mxu0  ;;  %v1387_v38 = vpop.f32.mrf.mxu1 }
 0x204   : > { %773 = vst [vmem:[%s2000_s21 + $0x4] sm:$0xf] %v772_v36 }
 0x205   : > { %v1368_v0 = vpop.f32.mrf.mxu0  ;;  %v769_v39 = vpop.f32.mrf.mxu1 }
 0x207   : > { %v1388_v40 = vpop.f32.mrf.mxu1 }
 0x21f   : > { %v873_v41 = vpop.f32.mrf.mxu0 }
 0x221   : > { %v1407_v42 = vpop.f32.mrf.mxu0  ;;  %v989_v43 = vpop.f32.mrf.mxu1 }
 0x223   : > { %v876_v44 = vpop.f32.mrf.mxu0  ;;  %v1427_v45 = vpop.f32.mrf.mxu1 }
 0x224   : > { %v1250_v46 = vpack.c.bf16 %v876_v44, %v873_v41 }
 0x225   : > { %v1408_v47 = vpop.f32.mrf.mxu0  ;;  %v992_v48 = vpop.f32.mrf.mxu1 }
 0x226   : > { %1262 = vst [vmem:[%s2000_s21 + $0x8] sm:$0xff] %v1250_v46   ;;  %v1255_v49 = vpack.c.bf16 %v992_v48, %v989_v43 }
 0x227   : > { %v1428_v50 = vpop.f32.mrf.mxu1 }
 0x228   : > { %1263 = vst [vmem:[%s2000_s21 + $0x10] sm:$0xff] %v1255_v49  }
 0x229   : > { %v997_v51 = vpop.f32.mrf.mxu1 }
 0x22b   : > { %v1431_v52 = vpop.f32.mrf.mxu1 }
 0x22d   : > { %v1000_v53 = vpop.f32.mrf.mxu1 }
 0x22e   : > { %v1260_v54 = vpack.c.bf16 %v1000_v53, %v997_v51 }
 0x22f   : > { %v1432_v55 = vpop.f32.mrf.mxu1 }
 0x230   : > { %1264 = vst [vmem:[%s2000_s21 + $0x18] sm:$0xff] %v1260_v54  }
 0x231   : > { %v1005_v56 = vpop.f32.mrf.mxu1 }
 0x232   : > { %v1246_v57 = vpack.c.bf16 %v1005_v56, %v1005_v56 }
 0x233   : > { %v1435_v58 = vpop.f32.mrf.mxu1 }
 0x234   : > { %1036 = vst [vmem:[%s2000_s21 + $0x20] sm:$0xf] %v1246_v57 }
 0x235   : > { %v1008_v59 = vpop.f32.mrf.mxu1 }
 0x236   : > { %1685 = shalt.err (!%p1682_p10)
}
 0x237   : > { %s1686_s5 = scalar_lea.hbm %s2014_s27, 576  ;;  %s1690_s0 = scalar_lea.hbm %s2066_s3, 1152 }
 0x238   : > { %p1687_p0 = scmp.ne.s32.totalorder %s2014_s27, %s1686_s5  ;;  %p1691_p7 = scmp.lt.s32.totalorder %s2014_s27, %s2066_s3 }
 0x239   : > { %p1692_p12 = scmp.lt.s32.totalorder %s1690_s0, %s1686_s5 }
 0x23a   : > { %p1688_p1 = pnand %p1687_p0, %p2088_p11 }
 0x23b   : > { %p1693_p2 = por %p1692_p12, %p1691_p7 }
 0x23c   : > { %p1689_p9 = pneg %p1688_p1 }
 0x23e   : > { %p1694_p6 = pnand %p1693_p2, %p1689_p9 }
 0x240   : > { %1697 = shalt.err (!%p1694_p6)
}
 0x241   : > { %s1772_s29 = smov 64   ;;  %s1773_s18 = smov 4   ;;  %v1436_v60 = vpop.f32.mrf.mxu1 }
 0x242   : > { %1449 = dma.vmem_to_hbm [thread:$0]  (%p2088_p11), %s2008_s24, 576, %s2014_s27, %s1038_s19, %s1772_s29, %s1772_s29, %s1773_s18  }
 0x243 PF: > { %s1066_s21 = sand.u32 1, %s1740_s12   ;;  %p2089_p5 = scmp.ne.s32.totalorder %s2076_s23, 0 }
 0x244   : > { %p2090_p13 = scmp.ge.s32.totalorder %s1760_s17, 2  ;;  %s1067_s6 = scalar_lea.sflag [#allocation5], %s1066_s21 }
 0x246   : > { %p1463_p4 = pnand %p2090_p13, %p2089_p5 }
 0x248   : > { %p1464_p3 = pneg %p1463_p4 }
 0x24a   : > { %1735 = dma.done.wait (%p1464_p3), %s1067_s6, 576  }
 0x24b   : > { %1737 = vsyncadd (%p1464_p3), %s1067_s6, 4294966720  ;;  %s20_s17 = sadd.s32 1, %s1760_s17   ;;  %s2091_s12 = smov %s1744_s13 }
 0x24c   : > { %p17_p8 = scmp.ge.s32.totalorder %s20_s17, 4   ;;  %s2092_s13 = smov %s1748_s14 }
 0x24d   : > { %s2093_s14 = smov %s1909_s8  ;;  %s2094_s15 = smov %s1756_s16 }
 0x24e   : > { %s2095_s16 = smov %s2097_s26  ;;  %19 = sbr.rel (!%p17_p8) target bundleno = 10 (0xa), region = 98 }
 0x253   :  { %1072 = vsyncpa [#allocation4], 1 }
 0x254   :  { %1074 = vsyncpa [#allocation4 + $0x1], 1 }
 0x255   :  { %1075 = vsyncpa [#allocation7], 1 }
 0x256   :  { %1077 = vsyncpa [#allocation7 + $0x1], 1 }
 0x257   :  { %1078 = vsyncpa [#allocation5], 1 }
 0x258   :  { %1080 = vsyncpa [#allocation5 + $0x1], 1 }

</bundles_post_ra>
